<compile_context>
chip_gen: v7x
topology: tpu7x:2x2x1
jax: 0.10.0
libtpu: 0.0.40
codegen_flags: <defaults>
</compile_context>

<pallas_src>
import functools
import math

import jax
import jax.numpy as jnp
from jax import lax
from jax.experimental import pallas as pl
from jax.experimental.pallas import tpu as pltpu


def _sum_pool_kernel(x_ref, out_ref, *, m_true, tn, sps, ragged):
    # x_ref  : (tb, tn, ceff)  current (batch-tile, node-tile) slab
    # out_ref: (1, tb, ceff)   f32 partial sums, VMEM-resident across reduction
    s = pl.program_id(0)   # TensorCore split (v7x)
    k = pl.program_id(2)   # reduction step within this split

    @pl.when(k == 0)
    def _():
        out_ref[...] = jnp.zeros_like(out_ref)

    x = x_ref[...].astype(jnp.float32)
    if ragged:
        # Last node tile overruns M: zero out out-of-range rows (one VPU select).
        base = (s * sps + k) * tn
        rows = base + lax.broadcasted_iota(jnp.int32, (tn, 1), 0)
        x = jnp.where((rows < m_true)[None, :, :], x, 0.0)

    out_ref[...] += jnp.sum(x, axis=1)[None]


def _sublane_multiple(dtype):
    """Minimum efficient sublane tile for the packed dtype."""
    return {4: 8, 2: 16, 1: 32}.get(jnp.dtype(dtype).itemsize, 8)


def _largest_divisor(total, target, multiple):
    """Largest d <= target dividing total with d % multiple == 0 or d == total."""
    target = max(1, min(total, target))
    for d in range(target, 0, -1):
        if total % d == 0 and (d == total or d % multiple == 0):
            return d
    return total


def _choose_pack(n, c):
    """r with (r*c) % 128 == 0, r | n, ideally r*c >= 512; else 1 (no repack)."""
    if c % 128 == 0:
        return 1
    r = 128 // math.gcd(c, 128)
    if n % r != 0:
        return 1  # free reshape impossible; keep native layout (still correct)
    while r * c < 512 and n % (2 * r) == 0:
        r *= 2
    return r


def _vmem_limits():
    """Generation-aware (physical VMEM) budgets; conservative fallback = v7x."""
    phys = 64 * 1024 * 1024
    try:
        phys = int(pltpu.get_tpu_info().vmem_capacity_bytes)
    except Exception:
        pass
    limit = min((phys * 3) // 4, 64 * 1024 * 1024)   # 48 MiB v7x, 64 MiB v5e/v6e
    block = min(limit // 3, 12 * 1024 * 1024)        # per input block, 2x buffered
    return limit, block


def pooling_layer(node_fea):
    """node_fea: (B, N, C) -> (B, C), mean over the node axis (dim=1)."""
    B, N, C = node_fea.shape
    in_dtype = node_fea.dtype
    elt = jnp.dtype(in_dtype).itemsize

    vmem_limit, block_bytes = _vmem_limits()

    # Lane-dense repack: (B, N, C) -> (B, M, r*C) is a free row-major reshape.
    r = _choose_pack(N, C)
    M = N // r
    ceff = r * C
    x = node_fea.reshape(B, M, ceff) if r > 1 else node_fea

    sub_mult = _sublane_multiple(in_dtype)

    # Batch tile: divisor of B, sublane-legal (multiple of 8 or full extent).
    tb_target = max(1, block_bytes // max(1, sub_mult * ceff * elt))
    tb = _largest_divisor(B, min(tb_target, 512), 8)
    b_blocks = B // tb

    # Node tile over M: multiple of the dtype's min sublane tile (or full M);
    # a non-divisor tail is handled by the in-kernel mask, never by tn=1.
    tn_target = max(1, block_bytes // max(1, tb * ceff * elt))
    if tn_target >= M:
        tn = M
    else:
        tn = min(M, max(sub_mult, (tn_target // sub_mult) * sub_mult))
    kt = pl.cdiv(M, tn)

    # v7x: keep both TensorCores busy when the batch axis has a single block.
    n_splits = 2 if (b_blocks < 2 and kt >= 4 and kt % 2 == 0) else 1
    sps = kt // n_splits
    ragged = (M % tn) != 0

    kernel = functools.partial(
        _sum_pool_kernel, m_true=M, tn=tn, sps=sps, ragged=ragged)

    cost = pl.CostEstimate(
        flops=B * N * C,                                   # reduction adds
        transcendentals=0,
        bytes_accessed=B * N * C * elt + n_splits * B * ceff * 4,
    )

    partial_sums = pl.pallas_call(
        kernel,
        out_shape=jax.ShapeDtypeStruct((n_splits, B, ceff), jnp.float32),
        grid_spec=pltpu.PrefetchScalarGridSpec(
            num_scalar_prefetch=0,
            grid=(n_splits, b_blocks, sps),
            in_specs=[
                pl.BlockSpec((tb, tn, ceff), lambda s, b, k: (b, s * sps + k, 0)),
            ],
            # Same output block across the whole reduction -> stays resident in
            # VMEM, written back to HBM once per (split, batch-tile).
            out_specs=pl.BlockSpec((1, tb, ceff), lambda s, b, k: (s, b, 0)),
        ),
        compiler_params=pltpu.CompilerParams(
            dimension_semantics=("parallel", "parallel", "arbitrary"),
            vmem_limit_bytes=vmem_limit,
        ),
        cost_estimate=cost,
    )(x)

    # Tiny XLA epilogue: fold core-split partials + r-fold lane packing, 1/N.
    pooled = partial_sums.sum(axis=0)                      # (B, r*C) f32
    if r > 1:
        pooled = pooled.reshape(B, r, C).sum(axis=1)       # (B, C) f32
    return (pooled * (1.0 / N)).astype(in_dtype)


def _reference(node_fea):
    return jnp.mean(node_fea, axis=1)


if __name__ == "__main__":
    key = jax.random.PRNGKey(0)
    B, N, C = 2, 16, 32

    node_fea = jax.random.normal(key, (B, N, C), dtype=jnp.float32)

    out = jax.block_until_ready(pooling_layer(node_fea))
    ref = _reference(node_fea)

    assert out.shape == (B, C)
    assert out.dtype == node_fea.dtype
    assert jnp.allclose(out, ref, atol=1e-5, rtol=1e-5)
    print("KERNEL_OK")
</pallas_src>

<mosaic_0001>
module attributes {stable_mosaic.version = 11 : i64} {
  func.func @_sum_pool_kernel(%arg0: i32, %arg1: i32, %arg2: i32, %arg3: memref<2x1x512xf32, #tpu.memory_space<vmem>>, %arg4: memref<1x2x512xf32, #tpu.memory_space<vmem>>) attributes {dimension_semantics = [#tpu.dimension_semantics<parallel>, #tpu.dimension_semantics<parallel>, #tpu.dimension_semantics<arbitrary>], iteration_bounds = array<i64: 1, 1, 1>, scalar_prefetch = 0 : i64, scratch_operands = 0 : i64, tpu.core_type = #tpu.core_type<tc>, window_params = [{transform_indices = @transform_0, window_bounds = array<i64: 2, 1, 512>}, {transform_indices = @transform_1, window_bounds = array<i64: 1, 2, 512>}]} {
    %c0_i32 = arith.constant 0 : i32
    %0 = arith.cmpi eq, %arg2, %c0_i32 : i32
    %1 = arith.extui %0 : i1 to i32
    %c0_i32_0 = arith.constant 0 : i32
    %2 = arith.cmpi ne, %1, %c0_i32_0 : i32
    scf.if %2 {
      %cst_9 = arith.constant 0.000000e+00 : f32
      %9 = vector.broadcast %cst_9 : f32 to vector<1x2x512xf32>
      %c0_10 = arith.constant 0 : index
      %c0_11 = arith.constant 0 : index
      %c0_12 = arith.constant 0 : index
      %10 = vector.load %arg4[%c0_10, %c0_11, %c0_12] : memref<1x2x512xf32, #tpu.memory_space<vmem>>, vector<1x2x512xf32>
      tpu.vector_store %arg4[%c0_10, %c0_11, %c0_12], %9 {strides = array<i32>} : memref<1x2x512xf32, #tpu.memory_space<vmem>>, vector<1x2x512xf32>,
    } else {
    }
    %c0 = arith.constant 0 : index
    %c0_1 = arith.constant 0 : index
    %c0_2 = arith.constant 0 : index
    %3 = vector.load %arg3[%c0, %c0_1, %c0_2] : memref<2x1x512xf32, #tpu.memory_space<vmem>>, vector<2x1x512xf32>
    %c0_3 = arith.constant 0 : index
    %c0_4 = arith.constant 0 : index
    %c0_5 = arith.constant 0 : index
    %4 = vector.load %arg4[%c0_3, %c0_4, %c0_5] : memref<1x2x512xf32, #tpu.memory_space<vmem>>, vector<1x2x512xf32>
    %cst = arith.constant dense<0.000000e+00> : vector<2x512xf32>
    %5 = vector.multi_reduction <add>, %3, %cst [1] : vector<2x1x512xf32> to vector<2x512xf32>
    %6 = vector.shape_cast %5 : vector<2x512xf32> to vector<1x2x512xf32>
    %7 = arith.addf %4, %6 : vector<1x2x512xf32>
    %c0_6 = arith.constant 0 : index
    %c0_7 = arith.constant 0 : index
    %c0_8 = arith.constant 0 : index
    %8 = vector.load %arg4[%c0_6, %c0_7, %c0_8] : memref<1x2x512xf32, #tpu.memory_space<vmem>>, vector<1x2x512xf32>
    tpu.vector_store %arg4[%c0_6, %c0_7, %c0_8], %7 {strides = array<i32>} : memref<1x2x512xf32, #tpu.memory_space<vmem>>, vector<1x2x512xf32>,
    return
  }
  func.func @transform_0(%arg0: i32, %arg1: i32, %arg2: i32) -> (i32, i32, i32) {
    %c1_i32 = arith.constant 1 : i32
    %0 = arith.muli %arg0, %c1_i32 : i32
    %1 = arith.addi %0, %arg2 : i32
    %c0_i32 = arith.constant 0 : i32
    %c0_i32_0 = arith.constant 0 : i32
    return %arg1, %1, %c0_i32 : i32, i32, i32
  }
  func.func @transform_1(%arg0: i32, %arg1: i32, %arg2: i32) -> (i32, i32, i32) {
    %c0_i32 = arith.constant 0 : i32
    %c0_i32_0 = arith.constant 0 : i32
    return %arg0, %arg1, %c0_i32 : i32, i32, i32
  }
}

</mosaic_0001>

<bundles_post_ra>
// kernel: tpu_custom_call.1
= control target key start
LH: loop header
LB: loop body
LE: loop exit
PB: predicated region body
PF: predicated region fallthrough
CT: control target
= control target key end

     0   :  { %6 = vsyncpa [#allocation3], 0  ;;  %s160_s0 = inlined_call_operand.hbm [shape: f32[2,1,512], index: 0, kind: input, shape index: {}]   ;;  %s161_s1 = inlined_call_operand.hbm [shape: f32[1,2,512], index: 1, kind: output, shape index: {}]  }
   0x1   :  { %7 = vsyncpa [#allocation4], 0  ;;  %s122_s6 = smov [#allocation2]   ;;  %s74_s10 = scalar_lea.hbm %s160_s0, 128 }
   0x2   :  { %s17_s7 = sshll.u32 %s122_s6, 4  ;;  %p75_p0 = scmp.ne.s32.totalorder %s160_s0, %s74_s10  ;;  %s18_s7 = int_to_ptr.vmem [resolvable:$true] %s17_s7 }
   0x3   :  { %p78_p1 = scmp.lt.u32.totalorder %s74_s10, %s160_s0 }
   0x5   :  { %p80_p2 = pnand %p78_p1, %p75_p0 }
   0x7   :  { %83 = shalt.err (!%p80_p2)
}
   0x8   :  { %s84_s15 = scalar_lea.vmem %s18_s7, 128  ;;  %p89_p4 = scmp.lt.s32.totalorder %s18_s7, %s18_s7 }
   0x9   :  { %p85_p3 = scmp.ne.s32.totalorder %s18_s7, %s84_s15  ;;  %p90_p5 = scmp.lt.s32.totalorder %s84_s15, %s84_s15 }
   0xb   :  { %p91_p6 = por %p90_p5, %p89_p4 }
   0xd   :  { %p92_p7 = pnand %p91_p6, %p85_p3 }
   0xf   :  { %95 = shalt.err (!%p92_p7)
}
  0x10   :  { %s123_s16 = smov 64   ;;  %s124_s17 = smov 4  }
  0x11   :  { %23 = dma.hbm_to_vmem [thread:$0]  %s160_s0, 128, %s18_s7, [#allocation3], %s123_s16, %s123_s16, %s124_s17  }
  0x12   :  { %118 = dma.done.wait [#allocation3], 128  }
  0x13   :  { %119 = vsyncadd [#allocation3], 4294967168  ;;  %v73_v0 = vld.sshfl [vmem:[#allocation2] sm:$0xff pattern:$0x73625140]  ;;  %s125_s20 = smov [#allocation5]  }
  0x14   :  { %s57_s21 = sshll.u32 %s125_s20, 4  ;;  %50 = vst [vmem:[#allocation5] sm:$0xff] %v73_v0  ;;  %s58_s21 = int_to_ptr.vmem [resolvable:$true] %s57_s21 }
  0x15   :  { %s96_s22 = scalar_lea.vmem %s58_s21, 128  ;;  %p101_p9 = scmp.lt.s32.totalorder %s58_s21, %s58_s21 }
  0x16   :  { %p97_p8 = scmp.ne.s32.totalorder %s58_s21, %s96_s22  ;;  %p102_p10 = scmp.lt.s32.totalorder %s96_s22, %s96_s22 }
  0x18   :  { %p103_p11 = por %p102_p10, %p101_p9 }
  0x1a   :  { %p104_p12 = pnand %p103_p11, %p97_p8 }
  0x1c   :  { %107 = shalt.err (!%p104_p12)
}
  0x1d   :  { %s108_s25 = scalar_lea.hbm %s161_s1, 128 }
  0x1e   :  { %p109_p13 = scmp.ne.s32.totalorder %s161_s1, %s108_s25  ;;  %p112_p0 = scmp.lt.u32.totalorder %s108_s25, %s161_s1 }
  0x20   :  { %p114_p1 = pnand %p112_p0, %p109_p13 }
  0x22   :  { %117 = shalt.err (!%p114_p1)
}
  0x23   :  { %60 = dma.vmem_to_hbm [thread:$0]  %s58_s21, 128, %s161_s1, [#allocation4]  }
  0x24   :  { %120 = dma.done.wait [#allocation4], 128  }
  0x25   :  { %121 = vsyncadd [#allocation4], 4294967168 }
  0x26   :  { %64 = vsyncpa [#allocation3], 1 }
  0x27   :  { %65 = vsyncpa [#allocation4], 1 }

</bundles_post_ra>
